<compile_context>
chip_gen: v6e
topology: v6e:2x2x1
jax: 0.10.0
libtpu: 0.0.40
codegen_flags: <defaults>
</compile_context>

<pallas_src>
import functools

import numpy as np
import jax
import jax.numpy as jnp
from jax import lax
from jax.experimental import pallas as pl
from jax.experimental.pallas import tpu as pltpu


def _round_up(x, m):
    return (x + m - 1) // m * m


def _vmem_budget_bytes():
    """~75% of per-core physical VMEM, leaving headroom for Pallas internals."""
    cap = 64 * 1024 * 1024  # conservative fallback (v7x-sized)
    try:
        info = pltpu.get_tpu_info()
        cap = int(getattr(info, "vmem_capacity_bytes", cap)) or cap
    except Exception:
        pass
    return (cap // 4) * 3


def _pick_lq_tile(Lq, per_row_bytes, fixed_bytes, budget):
    """Pick the query-tile size TQ and padded Lq against the VMEM budget."""
    cands = [t for t in (512, 384, 256, 128, 64, 32, 16, 8)
             if fixed_bytes + t * per_row_bytes <= budget]
    if not cands:
        # TODO(synk): Lk-streaming path when resident K/V alone exceed the budget.
        cands = [8]
    if Lq <= cands[0]:
        return Lq, Lq  # single full-extent tile: no padding, no output slicing
    # Largest tile with <=~12.5% Lq padding; otherwise minimize padding.
    limit = Lq + max(Lq // 8, 8)
    for t in cands:
        if _round_up(Lq, t) <= limit:
            return t, _round_up(Lq, t)
    best = min(cands, key=lambda t: (_round_up(Lq, t), -t))
    return best, _round_up(Lq, best)


def _make_attention_kernel(has_bias):
    def kernel(*refs):
        if has_bias:
            q_ref, k_ref, v_ref, b_ref, ctx_ref, attn_ref = refs
        else:
            q_ref, k_ref, v_ref, ctx_ref, attn_ref = refs

        # scores = q @ k^T without materializing k.T (contract last dims).
        # Operands already arrive in the MXU dtype (bf16 by default): no casts here.
        s = lax.dot_general(
            q_ref[0], k_ref[0],
            dimension_numbers=(((1,), (1,)), ((), ())),
            preferred_element_type=jnp.float32,
        )  # (TQ, Lk) f32

        if has_bias:
            # Additive mask bias: 0 where kept, -1e30 where masked (bf16 in HBM).
            s = s + b_ref[0].astype(jnp.float32)

        # Numerically stable softmax along Lk, all in f32.
        s_max = jnp.max(s, axis=-1, keepdims=True)
        e = jnp.exp(s - s_max)
        denom = jnp.sum(e, axis=-1, keepdims=True)
        attn = e * pl.reciprocal(denom, approx=True)  # EUP slot, not a VPU divide

        # One cast to the MXU dtype, reused for the attn store (when bf16) and PV.
        p = attn.astype(v_ref.dtype)
        attn_ref[0] = p if attn_ref.dtype == p.dtype else attn.astype(attn_ref.dtype)

        # dropout(p=0.0) is the identity.
        ctx_ref[0] = jnp.dot(
            p, v_ref[0], preferred_element_type=jnp.float32
        ).astype(ctx_ref.dtype)

    return kernel


@functools.partial(
    jax.jit, static_argnames=("scale", "has_mask", "mxu_bf16", "attn_dtype"))
def _dot_attention_impl(q, k, v, attn_mask, scale, has_mask, mxu_bf16, attn_dtype):
    B, Lq, D = q.shape
    _, Lk, _ = k.shape
    _, _, Dv = v.shape

    out_dtype = np.dtype(q.dtype)
    compute_dtype = np.dtype(jnp.bfloat16) if mxu_bf16 else np.dtype(jnp.float32)
    cbytes = compute_dtype.itemsize

    # --- VMEM-budgeted Lq tiling -------------------------------------------
    budget = _vmem_budget_bytes()
    fixed = 2 * cbytes * Lk * (D + Dv) + (2 << 20)      # resident K + V (dbl-buffered)
    per_row = (2 * cbytes * D                           # q block
               + (2 * 2 * Lk if has_mask else 0)        # bf16 bias block
               + 2 * attn_dtype.itemsize * Lk           # attn output block
               + 2 * out_dtype.itemsize * Dv            # context output block
               + 8 * Lk)                                # f32 scores + exp working set
    TQ, Lqp = _pick_lq_tile(Lq, per_row, fixed, budget)

    # --- single fused pass: scale-fold + cast (+ optional Lq pad) -----------
    qc = q.astype(jnp.float32) * scale if scale else q
    qc = qc.astype(compute_dtype)
    kc = k.astype(compute_dtype)
    vc = v.astype(compute_dtype)
    if Lqp != Lq:
        qc = jnp.pad(qc, ((0, 0), (0, Lqp - Lq), (0, 0)))

    inputs = [qc, kc, vc]
    in_specs = [
        pl.BlockSpec((1, TQ, D), lambda b, i: (b, i, 0)),
        # K / V do not depend on the Lq-tile index -> fetched once per batch.
        pl.BlockSpec((1, Lk, D), lambda b, i: (b, 0, 0)),
        pl.BlockSpec((1, Lk, Dv), lambda b, i: (b, 0, 0)),
    ]
    if has_mask:
        bias = jnp.where(attn_mask, -1e30, 0.0).astype(jnp.bfloat16)
        if Lqp != Lq:
            bias = jnp.pad(bias, ((0, 0), (0, Lqp - Lq), (0, 0)))
        inputs.append(bias)
        in_specs.append(pl.BlockSpec((1, TQ, Lk), lambda b, i: (b, i, 0)))

    ctx_p, attn_p = pl.pallas_call(
        _make_attention_kernel(has_mask),
        out_shape=(
            jax.ShapeDtypeStruct((B, Lqp, Dv), out_dtype),
            jax.ShapeDtypeStruct((B, Lqp, Lk), attn_dtype),
        ),
        grid=(B, Lqp // TQ),
        in_specs=in_specs,
        out_specs=(
            pl.BlockSpec((1, TQ, Dv), lambda b, i: (b, i, 0)),
            pl.BlockSpec((1, TQ, Lk), lambda b, i: (b, i, 0)),
        ),
        compiler_params=pltpu.CompilerParams(
            dimension_semantics=("parallel", "parallel"),
            vmem_limit_bytes=budget,
        ),
    )(*inputs)

    if Lqp != Lq:
        ctx_p = ctx_p[:, :Lq, :]
        attn_p = attn_p[:, :Lq, :]
    return ctx_p, attn_p


def dot_attention(q, k, v, scale=None, attn_mask=None, *, attn_dtype=None,
                  mxu_bf16=True):
    """JAX/Pallas equivalent of PyTorch dot_attention.forward.

    Returns (context, attention). attention_dropout=0.0 -> identity.
    mxu_bf16=True: matmuls use bf16 operands with f32 accumulation (softmax in f32).
    attn_dtype: dtype of the returned attention matrix (default = q.dtype); pass
    jnp.bfloat16 to halve the dominant HBM store of this mem-bound kernel.
    Note: masking uses -1e30 (not -inf), so fully-masked rows give a uniform
    distribution instead of torch's NaNs.
    """
    has_mask = attn_mask is not None
    a_dt = np.dtype(attn_dtype) if attn_dtype is not None else np.dtype(q.dtype)
    return _dot_attention_impl(q, k, v, attn_mask, scale, has_mask, mxu_bf16, a_dt)


def _reference(q, k, v, scale=None, attn_mask=None):
    attention = jnp.einsum("bqd,bkd->bqk", q, k)
    if scale:
        attention = attention * scale
    if attn_mask is not None:
        attention = jnp.where(attn_mask, -jnp.inf, attention)
    attention = jax.nn.softmax(attention, axis=2)
    context = jnp.einsum("bqk,bkd->bqd", attention, v)
    return context, attention


def _check(name, got, want, atol, rtol):
    got = jnp.asarray(got, dtype=jnp.float32)
    want = jnp.asarray(want, dtype=jnp.float32)
    assert jnp.allclose(got, want, atol=atol, rtol=rtol), f"{name} mismatch"


if __name__ == "__main__":
    key = jax.random.PRNGKey(0)
    kq, kk, kv, km, k2 = jax.random.split(key, 5)

    # Case 1: small aligned shapes, no mask (single full-extent tile).
    B, Lq, Lk, D, Dv = 2, 8, 8, 32, 32
    q = jax.random.normal(kq, (B, Lq, D), dtype=jnp.float32)
    k = jax.random.normal(kk, (B, Lk, D), dtype=jnp.float32)
    v = jax.random.normal(kv, (B, Lk, Dv), dtype=jnp.float32)
    scale = 1.0 / (D ** 0.5)
    ctx, attn = dot_attention(q, k, v, scale=scale)
    jax.block_until_ready((ctx, attn))
    ctx_r, attn_r = _reference(q, k, v, scale=scale)
    _check("context", ctx, ctx_r, 5e-2, 5e-2)
    _check("attention", attn, attn_r, 5e-2, 5e-2)
    assert jnp.allclose(jnp.sum(attn.astype(jnp.float32), axis=2), 1.0, atol=1e-2)

    # Case 2: mask + ragged (non-128 / non-8) shapes -> full-extent blocks, no pads.
    B2, Lq2, Lk2, D2, Dv2 = 2, 40, 24, 48, 40
    q2 = jax.random.normal(kq, (B2, Lq2, D2), dtype=jnp.float32)
    k2_ = jax.random.normal(kk, (B2, Lk2, D2), dtype=jnp.float32)
    v2 = jax.random.normal(kv, (B2, Lk2, Dv2), dtype=jnp.float32)
    mask2 = jax.random.bernoulli(km, 0.25, (B2, Lq2, Lk2))
    mask2 = mask2.at[:, :, 0].set(False)  # avoid fully-masked rows (NaN in reference)
    scale2 = 1.0 / (D2 ** 0.5)
    ctx2, attn2 = dot_attention(q2, k2_, v2, scale=scale2, attn_mask=mask2)
    jax.block_until_ready((ctx2, attn2))
    ctx2_r, attn2_r = _reference(q2, k2_, v2, scale=scale2, attn_mask=mask2)
    _check("context(mask)", ctx2, ctx2_r, 5e-2, 5e-2)
    _check("attention(mask)", attn2, attn2_r, 5e-2, 5e-2)
    assert jnp.allclose(jnp.sum(attn2.astype(jnp.float32), axis=2), 1.0, atol=1e-2)

    # Case 3: large Lq -> multi-tile grid, bf16 attention output.
    B3, Lq3, Lk3, D3, Dv3 = 2, 768, 200, 64, 48
    q3 = jax.random.normal(k2, (B3, Lq3, D3), dtype=jnp.float32)
    k3 = jax.random.normal(km, (B3, Lk3, D3), dtype=jnp.float32)
    v3 = jax.random.normal(kv, (B3, Lk3, Dv3), dtype=jnp.float32)
    scale3 = 1.0 / (D3 ** 0.5)
    ctx3, attn3 = dot_attention(q3, k3, v3, scale=scale3, attn_dtype=jnp.bfloat16)
    jax.block_until_ready((ctx3, attn3))
    ctx3_r, attn3_r = _reference(q3, k3, v3, scale=scale3)
    _check("context(tiled)", ctx3, ctx3_r, 5e-2, 5e-2)
    _check("attention(tiled,bf16)", attn3, attn3_r, 5e-2, 5e-2)
    assert jnp.allclose(jnp.sum(attn3.astype(jnp.float32), axis=2), 1.0, atol=2e-2)

    # Case 4: Lq not a multiple of the chosen tile -> exercises Lq pad + slice path.
    B4, Lq4, Lk4, D4, Dv4 = 2, 600, 64, 32, 32
    q4 = jax.random.normal(kq, (B4, Lq4, D4), dtype=jnp.float32)
    k4 = jax.random.normal(kk, (B4, Lk4, D4), dtype=jnp.float32)
    v4 = jax.random.normal(kv, (B4, Lk4, Dv4), dtype=jnp.float32)
    scale4 = 1.0 / (D4 ** 0.5)
    ctx4, attn4 = dot_attention(q4, k4, v4, scale=scale4)
    jax.block_until_ready((ctx4, attn4))
    ctx4_r, attn4_r = _reference(q4, k4, v4, scale=scale4)
    _check("context(padded)", ctx4, ctx4_r, 5e-2, 5e-2)
    _check("attention(padded)", attn4, attn4_r, 5e-2, 5e-2)
    assert jnp.allclose(jnp.sum(attn4.astype(jnp.float32), axis=2), 1.0, atol=1e-2)

    print("KERNEL_OK")
</pallas_src>

<mosaic_0001>
module attributes {stable_mosaic.version = 11 : i64} {
  func.func @kernel(%arg0: i32, %arg1: i32, %arg2: memref<1x8x32xbf16, #tpu.memory_space<vmem>>, %arg3: memref<1x8x32xbf16, #tpu.memory_space<vmem>>, %arg4: memref<1x8x32xbf16, #tpu.memory_space<vmem>>, %arg5: memref<1x8x32xf32, #tpu.memory_space<vmem>>, %arg6: memref<1x8x8xf32, #tpu.memory_space<vmem>>) attributes {dimension_semantics = [#tpu.dimension_semantics<parallel>, #tpu.dimension_semantics<parallel>], iteration_bounds = array<i64: 2, 1>, scalar_prefetch = 0 : i64, scratch_operands = 0 : i64, tpu.core_type = #tpu.core_type<tc>, window_params = [{transform_indices = @transform_0, window_bounds = array<i64: 1, 8, 32>}, {transform_indices = @transform_1, window_bounds = array<i64: 1, 8, 32>}, {transform_indices = @transform_2, window_bounds = array<i64: 1, 8, 32>}, {transform_indices = @transform_3, window_bounds = array<i64: 1, 8, 32>}, {transform_indices = @transform_4, window_bounds = array<i64: 1, 8, 8>}]} {
    %c0 = arith.constant 0 : index
    %c0_0 = arith.constant 0 : index
    %c0_1 = arith.constant 0 : index
    %0 = vector.load %arg2[%c0, %c0_0, %c0_1] : memref<1x8x32xbf16, #tpu.memory_space<vmem>>, vector<1x8x32xbf16>
    %1 = vector.shape_cast %0 : vector<1x8x32xbf16> to vector<8x32xbf16>
    %c0_2 = arith.constant 0 : index
    %c0_3 = arith.constant 0 : index
    %c0_4 = arith.constant 0 : index
    %2 = vector.load %arg3[%c0_2, %c0_3, %c0_4] : memref<1x8x32xbf16, #tpu.memory_space<vmem>>, vector<1x8x32xbf16>
    %3 = vector.shape_cast %2 : vector<1x8x32xbf16> to vector<8x32xbf16>
    %cst = arith.constant dense<0.000000e+00> : vector<8x8xf32>
    %4 = tpu.matmul %1, %3, %cst {dimension_numbers = #tpu.dot_dimension_numbers<[1], [1], [0], [0], [0, 0, 1, 0], [], []>} : vector<8x32xbf16>, vector<8x32xbf16>, vector<8x8xf32> -> vector<8x8xf32>
    %cst_5 = arith.constant dense<0xFF800000> : vector<8xf32>
    %5 = vector.multi_reduction <maximumf>, %4, %cst_5 [1] : vector<8x8xf32> to vector<8xf32>
    %6 = vector.shape_cast %5 : vector<8xf32> to vector<8x1xf32>
    %7 = vector.broadcast %6 : vector<8x1xf32> to vector<8x8xf32>
    %8 = arith.subf %4, %7 : vector<8x8xf32>
    %9 = math.exp %8 : vector<8x8xf32>
    %cst_6 = arith.constant dense<0.000000e+00> : vector<8xf32>
    %10 = vector.multi_reduction <add>, %9, %cst_6 [1] : vector<8x8xf32> to vector<8xf32>
    %11 = vector.shape_cast %10 : vector<8xf32> to vector<8x1xf32>
    %12 = tpu.reciprocal %11 {approx = true} : vector<8x1xf32> -> vector<8x1xf32>
    %13 = vector.broadcast %12 : vector<8x1xf32> to vector<8x8xf32>
    %14 = arith.mulf %9, %13 : vector<8x8xf32>
    %15 = arith.truncf %14 : vector<8x8xf32> to vector<8x8xbf16>
    %c0_7 = arith.constant 0 : index
    %c0_8 = arith.constant 0 : index
    %c0_9 = arith.constant 0 : index
    %16 = vector.load %arg6[%c0_7, %c0_8, %c0_9] : memref<1x8x8xf32, #tpu.memory_space<vmem>>, vector<1x8x8xf32>
    %17 = vector.shape_cast %16 : vector<1x8x8xf32> to vector<8x8xf32>
    %18 = vector.shape_cast %14 : vector<8x8xf32> to vector<1x8x8xf32>
    tpu.vector_store %arg6[%c0_7, %c0_8, %c0_9], %18 {strides = array<i32>} : memref<1x8x8xf32, #tpu.memory_space<vmem>>, vector<1x8x8xf32>,
    %c0_10 = arith.constant 0 : index
    %c0_11 = arith.constant 0 : index
    %c0_12 = arith.constant 0 : index
    %19 = vector.load %arg4[%c0_10, %c0_11, %c0_12] : memref<1x8x32xbf16, #tpu.memory_space<vmem>>, vector<1x8x32xbf16>
    %20 = vector.shape_cast %19 : vector<1x8x32xbf16> to vector<8x32xbf16>
    %cst_13 = arith.constant dense<0.000000e+00> : vector<8x32xf32>
    %21 = tpu.matmul %15, %20, %cst_13 {dimension_numbers = #tpu.dot_dimension_numbers<[1], [0], [0], [1], [0, 0, 1, 1], [], []>} : vector<8x8xbf16>, vector<8x32xbf16>, vector<8x32xf32> -> vector<8x32xf32>
    %c0_14 = arith.constant 0 : index
    %c0_15 = arith.constant 0 : index
    %c0_16 = arith.constant 0 : index
    %22 = vector.load %arg5[%c0_14, %c0_15, %c0_16] : memref<1x8x32xf32, #tpu.memory_space<vmem>>, vector<1x8x32xf32>
    %23 = vector.shape_cast %22 : vector<1x8x32xf32> to vector<8x32xf32>
    %24 = vector.shape_cast %21 : vector<8x32xf32> to vector<1x8x32xf32>
    tpu.vector_store %arg5[%c0_14, %c0_15, %c0_16], %24 {strides = array<i32>} : memref<1x8x32xf32, #tpu.memory_space<vmem>>, vector<1x8x32xf32>,
    return
  }
  func.func @transform_0(%arg0: i32, %arg1: i32) -> (i32, i32, i32) {
    %c0_i32 = arith.constant 0 : i32
    %c0_i32_0 = arith.constant 0 : i32
    return %arg0, %arg1, %c0_i32 : i32, i32, i32
  }
  func.func @transform_1(%arg0: i32, %arg1: i32) -> (i32, i32, i32) {
    %c0_i32 = arith.constant 0 : i32
    %c0_i32_0 = arith.constant 0 : i32
    %c0_i32_1 = arith.constant 0 : i32
    return %arg0, %c0_i32, %c0_i32_0 : i32, i32, i32
  }
  func.func @transform_2(%arg0: i32, %arg1: i32) -> (i32, i32, i32) {
    %c0_i32 = arith.constant 0 : i32
    %c0_i32_0 = arith.constant 0 : i32
    %c0_i32_1 = arith.constant 0 : i32
    return %arg0, %c0_i32, %c0_i32_0 : i32, i32, i32
  }
  func.func @transform_3(%arg0: i32, %arg1: i32) -> (i32, i32, i32) {
    %c0_i32 = arith.constant 0 : i32
    %c0_i32_0 = arith.constant 0 : i32
    return %arg0, %arg1, %c0_i32 : i32, i32, i32
  }
  func.func @transform_4(%arg0: i32, %arg1: i32) -> (i32, i32, i32) {
    %c0_i32 = arith.constant 0 : i32
    %c0_i32_0 = arith.constant 0 : i32
    return %arg0, %arg1, %c0_i32 : i32, i32, i32
  }
}

</mosaic_0001>

<bundles_post_ra>
// kernel: _dot_attention_impl.1
= control target key start
LH: loop header
LB: loop body
LE: loop exit
PB: predicated region body
PF: predicated region fallthrough
CT: control target
= control target key end

     0   :  { %10 = vsyncpa [#allocation3], 0  ;;  %s929_s0 = inlined_call_operand.vmem [shape: bf16[2,8,32], index: 0, kind: input, shape index: {}]   ;;  %s930_s1 = inlined_call_operand.vmem [shape: bf16[2,8,32], index: 1, kind: input, shape index: {}]   ;;  %s931_s2 = inlined_call_operand.vmem [shape: bf16[2,8,32], index: 2, kind: input, shape index: {}]   ;;  %s932_s3 = inlined_call_operand.hbm [shape: f32[2,8,32], index: 3, kind: output, shape index: {0}]   ;;  %s933_s4 = inlined_call_operand.hbm [shape: f32[2,8,8], index: 4, kind: output, shape index: {1}]  }
   0x1   :  { %12 = vsyncpa [#allocation3 + $0x1], 0 }
   0x2   :  { %13 = vsyncpa [#allocation5], 0 }
   0x3   :  { %15 = vsyncpa [#allocation5 + $0x1], 0  ;;  %s777_s15 = smov 0   ;;  %s779_s16 = smov 0  }
   0x4   :  { %s781_s17 = smov 0   ;;  %s783_s18 = smov 0  }
   0x5   :  { %s785_s19 = smov 0   ;;  %s787_s20 = smov 0  }
   0x6 LB: > { %s540_s21 = sadd.s32 4294967295, %s746_s20   ;;  %s541_s22 = sadd.s32 4294967294, %s746_s20   ;;  %s746_s20 = sphi %s787_s20, %s21_s20   ;;  %s742_s19 = sphi %s785_s19, %s940_s19   ;;  %s738_s18 = sphi %s783_s18, %s939_s18   ;;  %s734_s17 = sphi %s781_s17, %s938_s17   ;;  %s730_s16 = sphi %s779_s16, %s937_s16   ;;  %s726_s15 = sphi %s777_s15, %s936_s15  }
   0x7   : > { %s33_s23 = sadd.s32 1, %s742_s19  ;;  %s122_s24 = sadd.s32 1, %s734_s17 }
   0x8   : > { %p35_p0 = scmp.ge.s32.totalorder %s33_s23, 2  ;;  %p132_p1 = scmp.ne.s32.totalorder %s734_s17, %s730_s16 }
   0x9   : > { %p133_p2 = scmp.eq.s32.totalorder %s540_s21, 1  ;;  %p138_p3 = scmp.ne.s32.totalorder %s730_s16, %s726_s15 }
   0xa   : > { %s942_s23 = smov (%p35_p0, %s33_s23), 0  ;;  %p139_p5 = scmp.eq.s32.totalorder %s541_s22, 1 }
   0xb   : > { %p817_p4 = por %p133_p2, %p132_p1  ;;  %s117_s26 = ssub.s32 %s742_s19, %s942_s23 }
   0xc   : > { %p544_p6 = scmp.ge.s32.totalorder %s746_s20, 1  ;;  %p120_p7 = scmp.eq.s32.totalorder %s117_s26, 0 }
   0xd   : > { %p824_p8 = por %p139_p5, %p138_p3  ;;  %p209_p9 = scmp.lt.s32.totalorder %s746_s20, 3 }
   0xe   : > { %s830_s28 = scalar_select %p120_p7, %s734_s17, %s122_s24  }
   0xf   : > { %p210_p10 = pnand %p544_p6, %p209_p9 }
  0x10   : > { %p250_p11 = scmp.lt.s32.totalorder (!%p210_p10), %s738_s18, 1  ;;  %s848_s14 = sand.u32 (!%p210_p10), 1, %s730_s16  }
  0x11   : > { %213 = sbr.rel (%p210_p10) target bundleno = 751 (0x2ef), region = 32  ;;  %s545_s21 = sshll.u32 (!%p210_p10), %s848_s14, 3 }
  0x12   : > { %s249_s22 = scalar_lea.vmem (!%p210_p10), [#allocation4], %s545_s21  ;;  %s554_s24 = sshll.u32 (!%p210_p10), %s738_s18, 7 }
  0x13   : > { %s412_s5 = sshll.u32 (!%p210_p10), %s249_s22, 4  ;;  %s384_s6 = scalar_lea.sflag (!%p210_p10), [#allocation5], %s848_s14  ;;  %s413_s5 = int_to_ptr.vmem [resolvable:$true] %s412_s5 }
  0x14   : > { %s750_s8 = smov (!%p210_p10), [#allocation4]  }
  0x15   : > { %s644_s9 = sshll.u32 (!%p210_p10), %s750_s8, 4  ;;  %s645_s9 = int_to_ptr.vmem [resolvable:$false] %s644_s9 }
  0x16   : > { %v748_v0 = vmov 0.0   ;;  %vm749_vm0 = vmmov 0   ;;  %s251_s29 = scalar_select %p250_p11, %s738_s18, 1  ;;  %vm268_vm1 = vcmask 261120   ;;  %vm315_vm2 = vcmask 64512  }
  0x17   : > { %562 = vmatprep.subr.bf16.mxu0 %v748_v0  ;;  %564 = vmatprep.mubr.msk.bf16.mxu0 %vm749_vm0, %v748_v0  ;;  %vm333_vm3 = vcmask 1043456   ;;  %p647_p1 = scmp.lt.s32.totalorder %s413_s5, %s645_s9 }
  0x18   : > { %568 = vmatprep.subr.bf16.mxu1 %v748_v0  ;;  %570 = vmatprep.mubr.msk.bf16.mxu1 %vm749_vm0, %v748_v0  ;;  %s547_s30 = sshll.u32 %s251_s29, 2 }
  0x19   : > { %s260_s7 = scalar_lea.vmem %s930_s1, %s547_s30  ;;  %s256_s10 = scalar_lea.vmem %s929_s0, %s547_s30 }
  0x1a   : > { %v267_v1 = vld [vmem:[%s260_s7] sm:$0xf]  ;;  %s264_s13 = scalar_lea.vmem %s931_s2, %s547_s30  ;;  %s410_s30 = scalar_lea.hbm %s933_s4, %s554_s24 }
  0x1b   : > { %v273_v2 = vsel %vm268_vm1, %v267_v1, 0  ;;  %v266_v3 = vld [vmem:[%s256_s10] sm:$0xf]  ;;  %s640_s7 = scalar_lea.vmem %s413_s5, 128  ;;  %s646_s10 = scalar_lea.vmem %s645_s9, 256 }
  0x1c   : > { %563 = vmatpush3.bf16.xpose.msra.mxu0 %v273_v2  ;;  %v329_v14 = vld [vmem:[%s264_s13] sm:$0xf]  ;;  %p641_p12 = scmp.ne.s32.totalorder %s413_s5, %s640_s7  ;;  %p648_p2 = scmp.lt.s32.totalorder %s646_s10, %s640_s7 }
  0x1d   : > { %v335_v15 = vsel %vm333_vm3, %v329_v14, 0 }
  0x1e   : > { %569 = vmatpush3.bf16.msra.mxu1 %v335_v15  ;;  %p642_p13 = pnand %p641_p12, %p817_p4  ;;  %p649_p3 = por %p648_p2, %p647_p1 }
  0x20   : > { %p643_p0 = pneg %p642_p13 }
  0x22   : > { %p650_p5 = pnand %p649_p3, %p643_p0 }
  0x23   : > { %565 = vmatmul.mubr.msk.bf16.vlgmr.msra.gmra.mxu0 %vm268_vm1, %v266_v3 }
  0xe3   : > { %v309_v4 = vpop.f32.mrf.mxu0 }
  0xe4   : > { %v316_v5 = vsel %vm315_vm2, %v309_v4, -inf }
  0xe5   : > { %317 = vmax.xlane.f32.xlu0 %v316_v5  ;;  %v566_v6 = vpop.f32.mrf.mxu0 }
  0xe7   : > { %v312_v7 = vpop.f32.mrf.mxu0 }
  0xe9   : > { %v567_v8 = vpop.f32.mrf.mxu0 }
 0x16e   : > { %v318_v9 = vpop.xlane.xlu0 %317 }
 0x16f   : > { %v319_v10 = vsub.f32 %v309_v4, %v318_v9 }
 0x171   : > { %v320_v11 = vmul.f32 1.442695, %v319_v10 }
 0x173   : > { %636 = vpow2.f32 %v320_v11 }
 0x180   : > { %v637_v12 = vpop.eup %636 }
 0x181   : > { %v322_v13 = vsel %vm315_vm2, %v637_v12, 0.0 }
 0x182   : > { %323 = vadd.xlane.f32.xlu0 %v322_v13 }
 0x20b   : > { %v324_v16 = vpop.xlane.xlu0 %323 }
 0x20c   : > { %638 = vrcp.f32 %v324_v16 }
 0x219   : > { %v639_v17 = vpop.eup %638 }
 0x21a   : > { %v326_v18 = vmul.f32 %v639_v17, %v637_v12 }
 0x21c   : > { %v327_v19 = vpack.c.bf16 %v326_v18, %v326_v18  ;;  %328 = vst.msk [vmem:[%s249_s22] sm:$0xff] %vm315_vm2, %v326_v18 }
 0x21e   : > { %571 = vmatmul.mubr.msk.bf16.vlgmr.msra.gmra.mxu1 %vm315_vm2, %v327_v19 }
 0x21f   : > { %653 = shalt.err (!%p650_p5)
}
 0x220   : > { %s654_s11 = scalar_lea.hbm %s410_s30, 128  ;;  %s658_s22 = scalar_lea.hbm %s933_s4, 256 }
 0x221   : > { %p655_p6 = scmp.ne.s32.totalorder %s410_s30, %s654_s11  ;;  %p659_p10 = scmp.lt.s32.totalorder %s410_s30, %s933_s4 }
 0x222   : > { %p660_p11 = scmp.lt.s32.totalorder %s658_s22, %s654_s11 }
 0x223   : > { %p656_p7 = pnand %p655_p6, %p817_p4 }
 0x224   : > { %p661_p12 = por %p660_p11, %p659_p10 }
 0x225   : > { %p657_p9 = pneg %p656_p7 }
 0x227   : > { %p662_p13 = pnand %p661_p12, %p657_p9 }
 0x229   : > { %665 = shalt.err (!%p662_p13)
}
 0x22a   : > { %575 = dma.vmem_to_hbm [thread:$0]  (%p817_p4), %s413_s5, 128, %s410_s30, %s384_s6  }
 0x22b   : > { %s242_s7 = scalar_lea.vmem [#allocation2], %s545_s21  ;;  %s881_s12 = scalar_lea.hbm %s932_s3, %s554_s24 }
 0x22c   : > { %s398_s8 = sshll.u32 %s242_s7, 4  ;;  %s379_s11 = scalar_lea.sflag [#allocation3], %s848_s14  ;;  %s883_s8 = int_to_ptr.vmem [resolvable:$true] %s398_s8 }
 0x22d   : > { %s666_s30 = scalar_lea.vmem %s883_s8, 128  ;;  %s751_s18 = smov [#allocation2]  }
 0x22e   : > { %p667_p0 = scmp.ne.s32.totalorder %s883_s8, %s666_s30  ;;  %s670_s21 = sshll.u32 %s751_s18, 4  ;;  %s671_s21 = int_to_ptr.vmem [resolvable:$false] %s670_s21 }
 0x22f   : > { %s672_s24 = scalar_lea.vmem %s671_s21, 256  ;;  %p673_p3 = scmp.lt.s32.totalorder %s883_s8, %s671_s21 }
 0x230   : > { %p668_p1 = pnand %p667_p0, %p817_p4  ;;  %p674_p5 = scmp.lt.s32.totalorder %s672_s24, %s666_s30 }
 0x232   : > { %p669_p2 = pneg %p668_p1  ;;  %p675_p6 = por %p674_p5, %p673_p3 }
 0x234   : > { %p676_p7 = pnand %p675_p6, %p669_p2 }
 0x2de   : > { %v371_v20 = vpop.f32.mrf.mxu1 }
 0x2df   : > { %377 = vst.msk [vmem:[%s242_s7] sm:$0xff] %vm268_vm1, %v371_v20 }
 0x2e0   : > { %v572_v21 = vpop.f32.mrf.mxu1 }
 0x2e1   : > { %679 = shalt.err (!%p676_p7)
}
 0x2e2   : > { %s680_s5 = scalar_lea.hbm %s881_s12, 128  ;;  %s684_s13 = scalar_lea.hbm %s932_s3, 256 }
 0x2e3   : > { %p681_p9 = scmp.ne.s32.totalorder %s881_s12, %s680_s5  ;;  %p685_p12 = scmp.lt.s32.totalorder %s881_s12, %s932_s3 }
 0x2e4   : > { %p686_p13 = scmp.lt.s32.totalorder %s684_s13, %s680_s5 }
 0x2e5   : > { %p682_p10 = pnand %p681_p9, %p817_p4 }
 0x2e6   : > { %p687_p0 = por %p686_p13, %p685_p12 }
 0x2e7   : > { %p683_p11 = pneg %p682_p10 }
 0x2e9   : > { %p688_p1 = pnand %p687_p0, %p683_p11 }
 0x2eb   : > { %691 = shalt.err (!%p688_p1)
}
 0x2ec   : > { %574 = dma.vmem_to_hbm [thread:$0]  (%p817_p4), %s883_s8, 128, %s881_s12, %s379_s11   ;;  %v374_v22 = vpop.f32.mrf.mxu1 }
 0x2ee   : > { %v573_v23 = vpop.f32.mrf.mxu1 }
 0x2ef PF: > { %p585_p2 = scmp.ge.s32.totalorder %s746_s20, 2  ;;  %s424_s29 = sand.u32 1, %s726_s15  }
 0x2f0   : > { %s425_s7 = scalar_lea.sflag [#allocation3], %s424_s29 }
 0x2f1   : > { %p579_p3 = pnand %p585_p2, %p824_p8 }
 0x2f3   : > { %p580_p5 = pneg %p579_p3 }
 0x2f5   : > { %717 = dma.done.wait (%p580_p5), %s425_s7, 128  }
 0x2f6   : > { %719 = vsyncadd (%p580_p5), %s425_s7, 4294967168  ;;  %s434_s9 = scalar_lea.sflag [#allocation5], %s424_s29 }
 0x2f7   : > { %721 = dma.done.wait (%p580_p5), %s434_s9, 128  }
 0x2f8   : > { %723 = vsyncadd (%p580_p5), %s434_s9, 4294967168  ;;  %s21_s20 = sadd.s32 1, %s746_s20   ;;  %s936_s15 = smov %s730_s16 }
 0x2f9   : > { %p18_p4 = scmp.ge.s32.totalorder %s21_s20, 4   ;;  %s937_s16 = smov %s734_s17 }
 0x2fa   : > { %s938_s17 = smov %s830_s28  ;;  %s939_s18 = smov %s742_s19 }
 0x2fb   : > { %s940_s19 = smov %s942_s23  ;;  %20 = sbr.rel (!%p18_p4) target bundleno = 6 (0x6), region = 90 }
 0x300   :  { %439 = vsyncpa [#allocation3], 1 }
 0x301   :  { %441 = vsyncpa [#allocation3 + $0x1], 1 }
 0x302   :  { %442 = vsyncpa [#allocation5], 1 }
 0x303   :  { %444 = vsyncpa [#allocation5 + $0x1], 1 }

</bundles_post_ra>
